<compile_context>
chip_gen: v5e
topology: v5e:2x2
jax: 0.10.0
libtpu: 0.0.40
codegen_flags: <defaults>
</compile_context>

<pallas_src>
import numpy as np
import jax
import jax.numpy as jnp
from jax.experimental import pallas as pl
from jax.experimental.pallas import tpu as pltpu


_VMEM_BUDGET_BYTES = 12 * 1024 * 1024   # under the 16 MiB scoped default (v5e)
_TINY_THRESHOLD = 256 * 256             # dense-equivalent size; below -> plain JAX


def _round_up(n, m):
    return (n + m - 1) // m * m


def _block_circulant_kernel(w_ref, x_ref, o_ref):
    """One output-row tile of the block-circulant matvec.

    w_ref: (to, I)  weights in native layout: w_ref[t, j*B+s] = cir_w[o0+t, j, s]
    x_ref: (I, B)   all-shifts activations:   x_ref[j*B+s, n] = x[j*B + (n-s)%B]
    o_ref: (to, B)  output blocks, float32

    One lane-dense MXU matmul; f32 accumulation via preferred_element_type.
    (bf16 weight tile x f32 activations promotes to f32 before the dot; the
    convert of the small weight tile is VPU noise -- the kernel is weight-HBM
    bound, and the bf16 stream is what halves that traffic.)
    """
    o_ref[...] = jnp.dot(
        w_ref[...], x_ref[...], preferred_element_type=jnp.float32
    ).astype(o_ref.dtype)


def _shifted_x(x, ib, B):
    """X[j*B+s, n] = x[j*B + (n-s) mod B], shape (I, B), float32."""
    x2 = x.reshape(ib, B).astype(jnp.float32)
    n = jnp.arange(B)
    idx = (n[None, :] - n[:, None]) % B           # idx[s, n] = (n - s) mod B
    return jnp.take(x2, idx, axis=1).reshape(ib * B, B)


def _fft_linear_tiny(x, cir_weights):
    """Plain-JAX path for problems too small to amortize a Pallas call."""
    ob, ib, B = cir_weights.shape
    x2 = x.reshape(ib, B).astype(jnp.float32)
    n = jnp.arange(B)
    shift = (n[:, None] - n[None, :]) % B         # [n, k] -> (n - k) mod B
    w_mat = cir_weights.astype(jnp.float32)[:, :, shift]   # (ob, ib, B, B)
    y = jnp.einsum("ijnk,jk->in", w_mat, x2)
    return y.reshape(ob * B)


def _choose_tile_rows(ob, sublane, max_rows):
    """Largest divisor of ob that is a sublane multiple and <= max_rows,
    preferring one that yields >= 2 equal grid steps (v7x dual TensorCores).
    Returns None if no such divisor exists."""
    cands = [d for d in range(sublane, min(ob, max_rows) + 1, sublane)
             if ob % d == 0]
    if not cands:
        return None
    multi = [d for d in cands if ob // d >= 2]
    return max(multi) if multi else max(cands)


def fft_linear_forward(x, cir_weights, *, block_rows=None):
    """y = block_circulant(cir_weights) @ x.

    x:           (in_channels,) float
    cir_weights: (out_channels // B, in_channels // B, B).  The forward
                 streams this dtype as-is: cast to bfloat16 ONCE at init time
                 to halve the weight HBM traffic (the only traffic that
                 matters); accumulation is float32 either way.
    returns      (out_channels,) float32
    """
    ob, ib, B = cir_weights.shape
    out_ch, in_ch = ob * B, ib * B
    if x.shape != (in_ch,):
        raise ValueError(f"x must have shape ({in_ch},), got {x.shape}")
    # TODO(synk): a batched x of shape (M, I) would reuse each weight tile M
    # times and become MXU-bound; the reference forward is single-vector only.

    if out_ch * in_ch < _TINY_THRESHOLD:
        return _fft_linear_tiny(x, cir_weights)

    I = in_ch
    w2 = cir_weights.reshape(ob, I)               # free metadata reshape
    xs = _shifted_x(x, ib, B)                     # (I, B) float32

    w_itemsize = jnp.dtype(w2.dtype).itemsize
    sublane = {4: 8, 2: 16, 1: 32}[w_itemsize]
    x_bytes = I * B * 4
    per_row_bytes = I * w_itemsize + B * 4        # weight row + output row

    avail = _VMEM_BUDGET_BYTES - 2 * x_bytes      # X conservatively 2-buffered
    if avail < 2 * sublane * per_row_bytes:
        # All-shifts matrix (or even one minimal tile pair) won't fit VMEM.
        # TODO(synk): add a K-axis (input-block) grid with an f32 accumulator
        # for very large in_channels * block_size; plain XLA fallback for now
        # (still never materializes the dense B-fold-larger W_full).
        xs3 = xs.reshape(ib, B, B)
        y = jnp.einsum("ijs,jsn->in", cir_weights.astype(jnp.float32), xs3)
        return y.reshape(out_ch)

    max_rows = max(sublane, (avail // 2 // per_row_bytes) // sublane * sublane)
    if block_rows is not None:
        max_rows = min(max_rows,
                       max(sublane, int(block_rows) // sublane * sublane))

    to = _choose_tile_rows(ob, sublane, max_rows)
    ob_p = ob
    if to is None:
        if ob <= max_rows:
            to = ob                               # full-extent tile, grid=(1,)
        else:
            # Ragged ob larger than one tile: pad rows here.  This is an extra
            # HBM copy of the weights -- for repeated forwards, pre-pad the
            # parameter once at init time instead.
            to = max_rows
            ob_p = _round_up(ob, to)
            w2 = jnp.pad(w2, ((0, ob_p - ob), (0, 0)))

    grid = (ob_p // to,)
    cost = pl.CostEstimate(
        flops=2 * out_ch * in_ch,
        transcendentals=0,
        bytes_accessed=ob_p * I * w_itemsize + x_bytes + ob_p * B * 4,
    )

    y_blocks = pl.pallas_call(
        _block_circulant_kernel,
        out_shape=jax.ShapeDtypeStruct((ob_p, B), jnp.float32),
        grid=grid,
        in_specs=[
            pl.BlockSpec((to, I), lambda o: (o, 0)),   # weight row tile
            pl.BlockSpec((I, B), lambda o: (0, 0)),    # all-shifts x (reused)
        ],
        out_specs=pl.BlockSpec((to, B), lambda o: (o, 0)),
        compiler_params=pltpu.CompilerParams(
            dimension_semantics=("parallel",),         # v7x: 2 TCs
        ),
        cost_estimate=cost,
    )(w2, xs)

    return y_blocks[:ob].reshape(out_ch)


def _reference_fft_linear(x_np, w_np):
    """NumPy mirror of the PyTorch forward (FFT-based circular convolution)."""
    ob, ib, B = w_np.shape
    xf = np.fft.fft(x_np.reshape(ib, B).astype(np.float64), axis=-1)    # (ib, B)
    wf = np.fft.fft(w_np.astype(np.float64), axis=-1)                   # (ob, ib, B)
    y = np.real(np.fft.ifft(wf * xf[None, :, :], axis=-1)).sum(axis=1)  # (ob, B)
    return y.reshape(ob * B).astype(np.float32)


if __name__ == "__main__":
    key = jax.random.PRNGKey(0)
    k_w, k_x, k_wt, k_xt = jax.random.split(key, 4)

    # --- Pallas path: small but TPU-shaped layer, FFT_Linear(1024, 2048, 128).
    in_ch, out_ch, blk = 1024, 2048, 128
    cir_w = jax.random.uniform(
        k_w, (out_ch // blk, in_ch // blk, blk), dtype=jnp.float32)   # (16, 8, 128)
    x = jax.random.uniform(k_x, (in_ch,), dtype=jnp.float32)
    y_ref = _reference_fft_linear(np.asarray(x), np.asarray(cir_w))

    # float32 weights.
    y = jax.block_until_ready(fft_linear_forward(x, cir_w))
    assert y.shape == (out_ch,)
    np.testing.assert_allclose(np.asarray(y), y_ref, rtol=1e-4, atol=1e-2)

    # bfloat16 weights, cast ONCE at "init" time (recommended deployment mode:
    # halves the weight HBM stream; x and accumulation stay float32).
    cir_w_bf16 = cir_w.astype(jnp.bfloat16)
    y_bf16 = jax.block_until_ready(fft_linear_forward(x, cir_w_bf16))
    np.testing.assert_allclose(np.asarray(y_bf16), y_ref, rtol=2e-2, atol=2e-1)

    # --- Original spec shape FFT_Linear(10, 10, 5): tiny -> plain-JAX path.
    cir_w_t = jax.random.uniform(k_wt, (10 // 5, 10 // 5, 5), dtype=jnp.float32)
    x_t = jax.random.uniform(k_xt, (10,), dtype=jnp.float32)
    y_t = jax.block_until_ready(fft_linear_forward(x_t, cir_w_t))
    y_t_ref = _reference_fft_linear(np.asarray(x_t), np.asarray(cir_w_t))
    np.testing.assert_allclose(np.asarray(y_t), y_t_ref, rtol=1e-5, atol=1e-5)

    print("KERNEL_OK")
</pallas_src>

<mosaic_0001>
module attributes {stable_mosaic.version = 11 : i64} {
  func.func @_block_circulant_kernel(%arg0: i32, %arg1: memref<8x1024xf32, #tpu.memory_space<vmem>>, %arg2: memref<1024x128xf32, #tpu.memory_space<vmem>>, %arg3: memref<8x128xf32, #tpu.memory_space<vmem>>) attributes {dimension_semantics = [#tpu.dimension_semantics<parallel>], iteration_bounds = array<i64: 2>, scalar_prefetch = 0 : i64, scratch_operands = 0 : i64, tpu.core_type = #tpu.core_type<tc>, window_params = [{transform_indices = @transform_0, window_bounds = array<i64: 8, 1024>}, {pipeline_mode = #tpu.pipeline_mode<synchronous>, transform_indices = @transform_1, window_bounds = array<i64: 1024, 128>}, {transform_indices = @transform_2, window_bounds = array<i64: 8, 128>}]} {
    %c0 = arith.constant 0 : index
    %c0_0 = arith.constant 0 : index
    %0 = vector.load %arg1[%c0, %c0_0] : memref<8x1024xf32, #tpu.memory_space<vmem>>, vector<8x1024xf32>
    %c0_1 = arith.constant 0 : index
    %c0_2 = arith.constant 0 : index
    %1 = vector.load %arg2[%c0_1, %c0_2] : memref<1024x128xf32, #tpu.memory_space<vmem>>, vector<1024x128xf32>
    %cst = arith.constant dense<0.000000e+00> : vector<8x128xf32>
    %2 = tpu.matmul %0, %1, %cst {dimension_numbers = #tpu.dot_dimension_numbers<[1], [0], [0], [1], [0, 0, 1, 1], [], []>} : vector<8x1024xf32>, vector<1024x128xf32>, vector<8x128xf32> -> vector<8x128xf32>
    %c0_3 = arith.constant 0 : index
    %c0_4 = arith.constant 0 : index
    %3 = vector.load %arg3[%c0_3, %c0_4] : memref<8x128xf32, #tpu.memory_space<vmem>>, vector<8x128xf32>
    tpu.vector_store %arg3[%c0_3, %c0_4], %2 {strides = array<i32>} : memref<8x128xf32, #tpu.memory_space<vmem>>, vector<8x128xf32>,
    return
  }
  func.func @transform_0(%arg0: i32) -> (i32, i32) {
    %c0_i32 = arith.constant 0 : i32
    %c0_i32_0 = arith.constant 0 : i32
    return %arg0, %c0_i32 : i32, i32
  }
  func.func @transform_1(%arg0: i32) -> (i32, i32) {
    %c0_i32 = arith.constant 0 : i32
    %c0_i32_0 = arith.constant 0 : i32
    %c0_i32_1 = arith.constant 0 : i32
    return %c0_i32, %c0_i32_0 : i32, i32
  }
  func.func @transform_2(%arg0: i32) -> (i32, i32) {
    %c0_i32 = arith.constant 0 : i32
    %c0_i32_0 = arith.constant 0 : i32
    return %arg0, %c0_i32 : i32, i32
  }
}

</mosaic_0001>

<bundles_post_ra>
// kernel: tpu_custom_call.1
= control target key start
LH: loop header
LB: loop body
LE: loop exit
PB: predicated region body
PF: predicated region fallthrough
CT: control target
= control target key end

     0   :  { %7 = vsyncpa [#allocation3], 0  ;;  %s944_s0 = inlined_call_operand.hbm [shape: f32[16,1024], index: 0, kind: input, shape index: {}]   ;;  %s945_s1 = inlined_call_operand.hbm [shape: f32[1024,128], index: 1, kind: input, shape index: {}]   ;;  %s946_s2 = inlined_call_operand.hbm [shape: f32[16,128], index: 2, kind: output, shape index: {}]  }
   0x1   :  { %9 = vsyncpa [#allocation3 + $0x1], 0 }
   0x2   :  { %10 = vsyncpa [#allocation6], 0 }
   0x3   :  { %11 = vsyncpa [#allocation4], 0 }
   0x4   :  { %13 = vsyncpa [#allocation4 + $0x1], 0  ;;  %s797_s9 = smov 0   ;;  %s799_s10 = smov 0  }
   0x5   :  { %s801_s11 = smov 0   ;;  %s803_s12 = smov 0  }
   0x6 LB: > { %s108_s15 = sshll.u32 %s945_s1, 4  ;;  %s821_s16 = sadd.s32 4294967295, %s777_s12   ;;  %s777_s12 = sphi %s803_s12, %s956_s12   ;;  %s773_s11 = sphi %s801_s11, %s955_s11   ;;  %s769_s10 = sphi %s799_s10, %s954_s10   ;;  %s765_s9 = sphi %s797_s9, %s953_s9   ;;  %s109_s15 = int_to_ptr.hbm [resolvable:$true] %s108_s15 }
   0x7   : > { %p573_p0 = scmp.ge.s32.totalorder %s777_s12, 1  ;;  %p40_p1 = scmp.eq.s32.totalorder %s821_s16, 0 }
   0x8   : > { %p97_p2 = scmp.lt.s32.totalorder %s777_s12, 3  ;;  %s779_s18 = smov [#allocation5]  }
   0x9   : > { %s110_s19 = sshll.u32 %s779_s18, 4  ;;  %s780_s20 = smov 128   ;;  %s111_s19 = int_to_ptr.vmem [resolvable:$true] %s110_s19 }
   0xa   : > { %p826_p3 = pnand %p573_p0, %p97_p2  ;;  %s781_s21 = smov 8  }
   0xb   : > { %s572_s22 = sadd.s32 4294967294, %s777_s12   ;;  %s837_s23 = sadd.s32 1, %s777_s12  }
   0xc   : > { %p596_p4 = pneg %p826_p3  ;;  %s26_s24 = sadd.s32 1, %s773_s11 }
   0xd   : > { %s23_s25 = ssub.s32 %s777_s12, %s837_s23  ;;  %p33_p7 = scmp.ne.s32.totalorder %s773_s11, %s769_s10 }
   0xe   : > { %p597_p6 = pnand %p596_p4, %p40_p1  ;;  %p24_p8 = scmp.eq.s32.totalorder %s23_s25, 0 }
   0xf   : > { %p34_p9 = scmp.eq.s32.totalorder %s777_s12, 0  ;;  %p39_p10 = scmp.ne.s32.totalorder %s769_s10, %s765_s9 }
  0x10   : > { %599 = dma.hbm_to_vmem [thread:$0]  (!%p597_p6), %s109_s15, 16384, %s111_s19, [#allocation6], %s780_s20, %s780_s20, %s781_s21  }
  0x11   : > { %p84_p11 = scmp.eq.s32.totalorder %s821_s16, 1  ;;  %p853_p12 = por %p40_p1, %p39_p10 }
  0x12   : > { %s849_s26 = scalar_select %p24_p8, %s773_s11, %s26_s24  }
  0x13   : > { %p857_p13 = por %p84_p11, %p33_p7  ;;  %p90_p0 = scmp.eq.s32.totalorder %s572_s22, 1 }
  0x14   : > { %p35_p2 = por %p34_p9, %p33_p7  ;;  %s124_s29 = sand.u32 1, %s773_s11  }
  0x15   : > { %p862_p4 = por %p90_p0, %p39_p10  ;;  %p609_p6 = scmp.lt.s32.totalorder %s777_s12, 2 }
  0x16   : > { %s576_s3 = sshll.u32 %s124_s29, 6  ;;  %s587_s4 = sshll.u32 %s777_s12, 6 }
  0x17   : > { %s133_s7 = scalar_lea.hbm %s944_s0, %s587_s4  ;;  %s128_s13 = scalar_lea.vmem [#allocation2], %s576_s3 }
  0x18   : > { %s135_s8 = sshll.u32 %s133_s7, 4  ;;  %s137_s14 = sshll.u32 %s128_s13, 4  ;;  %s136_s8 = int_to_ptr.hbm [resolvable:$true] %s135_s8  ;;  %s138_s14 = int_to_ptr.vmem [resolvable:$true] %s137_s14 }
  0x19   : > { %p871_p8 = pnand %p609_p6, %p35_p2  ;;  %s125_s18 = scalar_lea.sflag [#allocation3], %s124_s29 }
  0x1a   : > { %s677_s19 = sshra.s32 %s136_s8, 4  ;;  %s684_s24 = scalar_lea.hbm %s944_s0, 128  ;;  %s678_s19 = int_to_ptr.hbm [resolvable:$true] %s677_s19 }
  0x1b   : > { %s679_s20 = scalar_lea.hbm %s678_s19, 64  ;;  %p681_p9 = pneg %p871_p8 }
  0x1c   : > { %p680_p7 = scmp.ne.s32.totalorder %s678_s19, %s679_s20  ;;  %p685_p0 = scmp.lt.s32.totalorder %s678_s19, %s944_s0 }
  0x1d   : > { %p686_p2 = scmp.lt.s32.totalorder %s684_s24, %s679_s20 }
  0x1e   : > { %p682_p10 = pnand %p681_p9, %p680_p7 }
  0x1f   : > { %p687_p6 = por %p686_p2, %p685_p0 }
  0x20   : > { %p683_p11 = pneg %p682_p10 }
  0x22   : > { %p688_p5 = pnand %p687_p6, %p683_p11 }
  0x24   : > { %691 = shalt.err (!%p688_p5)
}
  0x25   : > { %603 = dma.hbm_to_vmem [thread:$0]  (!%p871_p8), %s136_s8, 1024, %s138_s14, %s125_s18  }
  0x26   : > { %146 = sbr.rel (%p826_p3) target bundleno = 252 (0xfc), region = 28  ;;  %s888_s29 = sand.u32 (!%p826_p3), 1, %s769_s10  }
  0x27   : > { %s580_s4 = sshll.u32 (!%p826_p3), %s888_s29, 6  ;;  %s149_s5 = scalar_lea.sflag (!%p826_p3), [#allocation3], %s888_s29 }
  0x28   : > { %s892_s6 = scalar_lea.vmem (!%p826_p3), [#allocation2], %s580_s4 }
  0x2b   : > { %752 = dma.done.wait (%p853_p12), %s149_s5, 1024  }
  0x2c   : > { %754 = vsyncadd (%p853_p12), %s149_s5, 4294966272 }
  0x2d   : > { %756 = dma.done.wait (%p40_p1), [#allocation6], 16384  }
  0x2e   : > { %758 = vsyncadd (%p40_p1), [#allocation6], 4294950912  ;;  %v202_v0 = vld [vmem:[#allocation5 + $0x78] sm:$0xff]  ;;  %v201_v2 = vld [vmem:[#allocation5 + $0x70] sm:$0xff]  ;;  %s582_s17 = sshll.u32 %s888_s29, 3  ;;  %s584_s27 = sshll.u32 %s821_s16, 3 }
  0x2f   : > { %v234_v1 = vld [vmem:[#allocation5 + $0x178] sm:$0xff]  ;;  %315 = vmatpush.msra.mxu0 %v202_v0  ;;  %v233_v4 = vld [vmem:[#allocation5 + $0x170] sm:$0xff]  ;;  %v200_v6 = vld [vmem:[#allocation5 + $0x68] sm:$0xff]  ;;  %s487_s13 = scalar_lea.hbm %s946_s2, %s584_s27  ;;  %s178_s14 = scalar_lea.vmem [#allocation7], %s582_s17 }
  0x30   : > { %355 = vmatpush.msra.mxu2 %v234_v1  ;;  %v218_v3 = vld [vmem:[#allocation5 + $0xf8] sm:$0xff]  ;;  %v217_v7 = vld [vmem:[#allocation5 + $0xf0] sm:$0xff]  ;;  %v232_v8 = vld [vmem:[#allocation5 + $0x168] sm:$0xff]  ;;  %s489_s15 = sshll.u32 %s178_s14, 4  ;;  %s491_s18 = sshll.u32 %s487_s13, 4  ;;  %s490_s15 = int_to_ptr.vmem [resolvable:$true] %s489_s15  ;;  %s492_s18 = int_to_ptr.hbm [resolvable:$true] %s491_s18 }
  0x31   : > { %v250_v5 = vld [vmem:[#allocation5 + $0x1f8] sm:$0xff]  ;;  %335 = vmatpush.msra.mxu1 %v218_v3  ;;  %316 = vmatpush.msra.mxu0 %v201_v2  ;;  %v249_v9 = vld [vmem:[#allocation5 + $0x1f0] sm:$0xff]  ;;  %v216_v10 = vld [vmem:[#allocation5 + $0xe8] sm:$0xff]  ;;  %s477_s19 = scalar_lea.sflag [#allocation4], %s888_s29  ;;  %s721_s16 = sshra.s32 %s492_s18, 4  ;;  %s722_s16 = int_to_ptr.hbm [resolvable:$true] %s721_s16 }
  0x32   : > { %375 = vmatpush.msra.mxu3 %v250_v5  ;;  %356 = vmatpush.msra.mxu2 %v233_v4  ;;  %v199_v11 = vld [vmem:[#allocation5 + $0x60] sm:$0xff]  ;;  %v248_v13 = vld [vmem:[#allocation5 + $0x1e8] sm:$0xff]  ;;  %v198_v16 = vld [vmem:[#allocation5 + $0x58] sm:$0xff]  ;;  %s723_s20 = scalar_lea.hbm %s722_s16, 8  ;;  %s727_s24 = scalar_lea.hbm %s946_s2, 16 }
  0x33   : > { %336 = vmatpush.msra.mxu1 %v217_v7  ;;  %v231_v12 = vld [vmem:[#allocation5 + $0x160] sm:$0xff]  ;;  %317 = vmatpush.msra.mxu0 %v200_v6  ;;  %v230_v17 = vld [vmem:[#allocation5 + $0x158] sm:$0xff]  ;;  %v197_v20 = vld [vmem:[#allocation5 + $0x50] sm:$0xff]  ;;  %p724_p1 = scmp.ne.s32.totalorder %s722_s16, %s723_s20  ;;  %p728_p12 = scmp.lt.s32.totalorder %s722_s16, %s946_s2 }
  0x34   : > { %376 = vmatpush.msra.mxu3 %v249_v9  ;;  %357 = vmatpush.msra.mxu2 %v232_v8  ;;  %v215_v14 = vld [vmem:[#allocation5 + $0xe0] sm:$0xff]  ;;  %v214_v18 = vld [vmem:[#allocation5 + $0xd8] sm:$0xff]  ;;  %v229_v21 = vld [vmem:[#allocation5 + $0x150] sm:$0xff]  ;;  %p729_p8 = scmp.lt.s32.totalorder %s727_s24, %s723_s20 }
  0x35   : > { %v247_v15 = vld [vmem:[#allocation5 + $0x1e0] sm:$0xff]  ;;  %337 = vmatpush.msra.mxu1 %v216_v10  ;;  %318 = vmatpush.msra.mxu0 %v199_v11  ;;  %v246_v19 = vld [vmem:[#allocation5 + $0x1d8] sm:$0xff]  ;;  %v213_v22 = vld [vmem:[#allocation5 + $0xd0] sm:$0xff]  ;;  %p725_p3 = pnand %p724_p1, %p857_p13 }
  0x36   : > { %377 = vmatpush.msra.mxu3 %v248_v13  ;;  %358 = vmatpush.msra.mxu2 %v231_v12  ;;  %v245_v23 = vld [vmem:[#allocation5 + $0x1d0] sm:$0xff]  ;;  %v196_v24 = vld [vmem:[#allocation5 + $0x48] sm:$0xff]  ;;  %v195_v28 = vld [vmem:[#allocation5 + $0x40] sm:$0xff]  ;;  %p730_p7 = por %p729_p8, %p728_p12 }
  0x37   : > { %338 = vmatpush.msra.mxu1 %v215_v14  ;;  %319 = vmatpush.msra.mxu0 %v198_v16  ;;  %v228_v25 = vld [vmem:[#allocation5 + $0x148] sm:$0xff]  ;;  %v227_v29 = vld [vmem:[#allocation5 + $0x140] sm:$0xff]  ;;  %v194_v32 = vld [vmem:[#allocation5 + $0x38] sm:$0xff]  ;;  %p726_p5 = pneg %p725_p3 }
  0x38   : > { %378 = vmatpush.msra.mxu3 %v247_v15  ;;  %359 = vmatpush.msra.mxu2 %v230_v17  ;;  %v212_v26 = vld [vmem:[#allocation5 + $0xc8] sm:$0xff]  ;;  %v211_v30 = vld [vmem:[#allocation5 + $0xc0] sm:$0xff]  ;;  %v226_v33 = vld [vmem:[#allocation5 + $0x138] sm:$0xff] }
  0x39   : > { %339 = vmatpush.msra.mxu1 %v214_v18  ;;  %320 = vmatpush.msra.mxu0 %v197_v20  ;;  %v244_v27 = vld [vmem:[#allocation5 + $0x1c8] sm:$0xff]  ;;  %v243_v31 = vld [vmem:[#allocation5 + $0x1c0] sm:$0xff]  ;;  %v210_v34 = vld [vmem:[#allocation5 + $0xb8] sm:$0xff]  ;;  %p731_p9 = pnand %p730_p7, %p726_p5 }
  0x3a   : > { %379 = vmatpush.msra.mxu3 %v246_v19  ;;  %360 = vmatpush.msra.mxu2 %v229_v21  ;;  %v242_v35 = vld [vmem:[#allocation5 + $0x1b8] sm:$0xff]  ;;  %v193_v36 = vld [vmem:[#allocation5 + $0x30] sm:$0xff]  ;;  %v192_v40 = vld [vmem:[#allocation5 + $0x28] sm:$0xff] }
  0x3b   : > { %340 = vmatpush.msra.mxu1 %v213_v22  ;;  %321 = vmatpush.msra.mxu0 %v196_v24  ;;  %v225_v37 = vld [vmem:[#allocation5 + $0x130] sm:$0xff]  ;;  %v224_v41 = vld [vmem:[#allocation5 + $0x128] sm:$0xff]  ;;  %v191_v44 = vld [vmem:[#allocation5 + $0x20] sm:$0xff] }
  0x3c   : > { %380 = vmatpush.msra.mxu3 %v245_v23  ;;  %361 = vmatpush.msra.mxu2 %v228_v25  ;;  %v209_v38 = vld [vmem:[#allocation5 + $0xb0] sm:$0xff]  ;;  %v208_v42 = vld [vmem:[#allocation5 + $0xa8] sm:$0xff]  ;;  %v223_v45 = vld [vmem:[#allocation5 + $0x120] sm:$0xff] }
  0x3d   : > { %341 = vmatpush.msra.mxu1 %v212_v26  ;;  %322 = vmatpush.msra.mxu0 %v195_v28  ;;  %v241_v39 = vld [vmem:[#allocation5 + $0x1b0] sm:$0xff]  ;;  %v240_v43 = vld [vmem:[#allocation5 + $0x1a8] sm:$0xff]  ;;  %v207_v46 = vld [vmem:[#allocation5 + $0xa0] sm:$0xff] }
  0x3e   : > { %381 = vmatpush.msra.mxu3 %v244_v27  ;;  %362 = vmatpush.msra.mxu2 %v227_v29  ;;  %v239_v47 = vld [vmem:[#allocation5 + $0x1a0] sm:$0xff]  ;;  %v190_v48 = vld [vmem:[#allocation5 + $0x18] sm:$0xff]  ;;  %v189_v52 = vld [vmem:[#allocation5 + $0x10] sm:$0xff] }
  0x3f   : > { %342 = vmatpush.msra.mxu1 %v211_v30  ;;  %323 = vmatpush.msra.mxu0 %v194_v32  ;;  %v222_v49 = vld [vmem:[#allocation5 + $0x118] sm:$0xff]  ;;  %v221_v53 = vld [vmem:[#allocation5 + $0x110] sm:$0xff]  ;;  %v188_v56 = vld [vmem:[#allocation5 + $0x8] sm:$0xff] }
  0x40   : > { %382 = vmatpush.msra.mxu3 %v243_v31  ;;  %363 = vmatpush.msra.mxu2 %v226_v33  ;;  %v206_v50 = vld [vmem:[#allocation5 + $0x98] sm:$0xff]  ;;  %v205_v54 = vld [vmem:[#allocation5 + $0x90] sm:$0xff]  ;;  %v220_v57 = vld [vmem:[#allocation5 + $0x108] sm:$0xff] }
  0x41   : > { %343 = vmatpush.msra.mxu1 %v210_v34  ;;  %324 = vmatpush.msra.mxu0 %v193_v36  ;;  %v238_v51 = vld [vmem:[#allocation5 + $0x198] sm:$0xff]  ;;  %v237_v55 = vld [vmem:[#allocation5 + $0x190] sm:$0xff]  ;;  %v204_v58 = vld [vmem:[#allocation5 + $0x88] sm:$0xff] }
  0x42   : > { %383 = vmatpush.msra.mxu3 %v242_v35  ;;  %364 = vmatpush.msra.mxu2 %v225_v37  ;;  %v236_v59 = vld [vmem:[#allocation5 + $0x188] sm:$0xff]  ;;  %v187_v60 = vld [vmem:[#allocation5] sm:$0xff]  ;;  %v266_v62 = vld [vmem:[#allocation5 + $0x278] sm:$0xff] }
  0x43   : > { %344 = vmatpush.msra.mxu1 %v209_v38  ;;  %325 = vmatpush.msra.mxu0 %v192_v40  ;;  %v219_v61 = vld [vmem:[#allocation5 + $0x100] sm:$0xff]  ;;  %v298_v63 = vld [vmem:[#allocation5 + $0x378] sm:$0xff]  ;;  %v265_v2 = vld [vmem:[#allocation5 + $0x270] sm:$0xff] }
  0x44   : > { %384 = vmatpush.msra.mxu3 %v241_v39  ;;  %365 = vmatpush.msra.mxu2 %v224_v41  ;;  %v203_v0 = vld [vmem:[#allocation5 + $0x80] sm:$0xff]  ;;  %v282_v3 = vld [vmem:[#allocation5 + $0x2f8] sm:$0xff]  ;;  %v297_v4 = vld [vmem:[#allocation5 + $0x370] sm:$0xff] }
  0x45   : > { %345 = vmatpush.msra.mxu1 %v208_v42  ;;  %326 = vmatpush.msra.mxu0 %v191_v44  ;;  %v235_v1 = vld [vmem:[#allocation5 + $0x180] sm:$0xff]  ;;  %v314_v5 = vld [vmem:[#allocation5 + $0x3f8] sm:$0xff]  ;;  %v264_v6 = vld [vmem:[#allocation5 + $0x268] sm:$0xff] }
  0x46   : > { %385 = vmatpush.msra.mxu3 %v240_v43  ;;  %366 = vmatpush.msra.mxu2 %v223_v45  ;;  %v281_v7 = vld [vmem:[#allocation5 + $0x2f0] sm:$0xff]  ;;  %v296_v8 = vld [vmem:[#allocation5 + $0x368] sm:$0xff]  ;;  %v263_v10 = vld [vmem:[#allocation5 + $0x260] sm:$0xff] }
  0x47   : > { %346 = vmatpush.msra.mxu1 %v207_v46  ;;  %327 = vmatpush.msra.mxu0 %v190_v48  ;;  %v313_v9 = vld [vmem:[#allocation5 + $0x3f0] sm:$0xff]  ;;  %v280_v11 = vld [vmem:[#allocation5 + $0x2e8] sm:$0xff]  ;;  %v295_v12 = vld [vmem:[#allocation5 + $0x360] sm:$0xff] }
  0x48   : > { %386 = vmatpush.msra.mxu3 %v239_v47  ;;  %367 = vmatpush.msra.mxu2 %v222_v49  ;;  %v312_v13 = vld [vmem:[#allocation5 + $0x3e8] sm:$0xff]  ;;  %v262_v14 = vld [vmem:[#allocation5 + $0x258] sm:$0xff]  ;;  %v279_v15 = vld [vmem:[#allocation5 + $0x2e0] sm:$0xff] }
  0x49   : > { %347 = vmatpush.msra.mxu1 %v206_v50  ;;  %328 = vmatpush.msra.mxu0 %v189_v52  ;;  %v294_v16 = vld [vmem:[#allocation5 + $0x358] sm:$0xff]  ;;  %v311_v17 = vld [vmem:[#allocation5 + $0x3e0] sm:$0xff]  ;;  %v261_v18 = vld [vmem:[#allocation5 + $0x250] sm:$0xff] }
  0x4a   : > { %387 = vmatpush.msra.mxu3 %v238_v51  ;;  %368 = vmatpush.msra.mxu2 %v221_v53  ;;  %v278_v19 = vld [vmem:[#allocation5 + $0x2d8] sm:$0xff]  ;;  %v293_v20 = vld [vmem:[#allocation5 + $0x350] sm:$0xff]  ;;  %v260_v22 = vld [vmem:[#allocation5 + $0x248] sm:$0xff] }
  0x4b   : > { %348 = vmatpush.msra.mxu1 %v205_v54  ;;  %329 = vmatpush.msra.mxu0 %v188_v56  ;;  %v310_v21 = vld [vmem:[#allocation5 + $0x3d8] sm:$0xff]  ;;  %v277_v23 = vld [vmem:[#allocation5 + $0x2d0] sm:$0xff]  ;;  %v292_v24 = vld [vmem:[#allocation5 + $0x348] sm:$0xff] }
  0x4c   : > { %388 = vmatpush.msra.mxu3 %v237_v55  ;;  %369 = vmatpush.msra.mxu2 %v220_v57  ;;  %v309_v25 = vld [vmem:[#allocation5 + $0x3d0] sm:$0xff]  ;;  %v259_v26 = vld [vmem:[#allocation5 + $0x240] sm:$0xff]  ;;  %v276_v27 = vld [vmem:[#allocation5 + $0x2c8] sm:$0xff] }
  0x4d   : > { %349 = vmatpush.msra.mxu1 %v204_v58  ;;  %330 = vmatpush.msra.mxu0 %v187_v60  ;;  %v291_v28 = vld [vmem:[#allocation5 + $0x340] sm:$0xff]  ;;  %v308_v29 = vld [vmem:[#allocation5 + $0x3c8] sm:$0xff]  ;;  %v258_v30 = vld [vmem:[#allocation5 + $0x238] sm:$0xff] }
  0x4e   : > { %389 = vmatpush.msra.mxu3 %v236_v59  ;;  %370 = vmatpush.msra.mxu2 %v219_v61  ;;  %v275_v31 = vld [vmem:[#allocation5 + $0x2c0] sm:$0xff]  ;;  %v290_v32 = vld [vmem:[#allocation5 + $0x338] sm:$0xff]  ;;  %v257_v34 = vld [vmem:[#allocation5 + $0x230] sm:$0xff] }
  0x4f   : > { %395 = vmatpush.msrb.mxu0 %v266_v62  ;;  %350 = vmatpush.msra.mxu1 %v203_v0  ;;  %v307_v33 = vld [vmem:[#allocation5 + $0x3c0] sm:$0xff]  ;;  %v274_v35 = vld [vmem:[#allocation5 + $0x2b8] sm:$0xff]  ;;  %v289_v36 = vld [vmem:[#allocation5 + $0x330] sm:$0xff] }
  0x50   : > { %435 = vmatpush.msrb.mxu2 %v298_v63  ;;  %390 = vmatpush.msra.mxu3 %v235_v1  ;;  %v306_v37 = vld [vmem:[#allocation5 + $0x3b8] sm:$0xff]  ;;  %v256_v38 = vld [vmem:[#allocation5 + $0x228] sm:$0xff]  ;;  %v273_v39 = vld [vmem:[#allocation5 + $0x2b0] sm:$0xff] }
  0x51   : > { %396 = vmatpush.msrb.mxu0 %v265_v2  ;;  %415 = vmatpush.msrb.mxu1 %v282_v3  ;;  %v288_v40 = vld [vmem:[#allocation5 + $0x328] sm:$0xff]  ;;  %v305_v41 = vld [vmem:[#allocation5 + $0x3b0] sm:$0xff]  ;;  %v255_v43 = vld [vmem:[#allocation5 + $0x220] sm:$0xff] }
  0x52   : > { %436 = vmatpush.msrb.mxu2 %v297_v4  ;;  %455 = vmatpush.msrb.mxu3 %v314_v5  ;;  %v181_v42 = vld [vmem:[%s892_s6 + $0x10] sm:$0xff]  ;;  %v272_v44 = vld [vmem:[#allocation5 + $0x2a8] sm:$0xff]  ;;  %v287_v45 = vld [vmem:[#allocation5 + $0x320] sm:$0xff] }
  0x53   : > { %397 = vmatpush.msrb.mxu0 %v264_v6  ;;  %416 = vmatpush.msrb.mxu1 %v281_v7  ;;  %v304_v46 = vld [vmem:[#allocation5 + $0x3a8] sm:$0xff]  ;;  %v179_v47 = vld [vmem:[%s892_s6] sm:$0xff]  ;;  %v182_v48 = vld [vmem:[%s892_s6 + $0x18] sm:$0xff] }
  0x54   : > { %437 = vmatpush.msrb.mxu2 %v296_v8  ;;  %456 = vmatpush.msrb.mxu3 %v313_v9  ;;  %v254_v49 = vld [vmem:[#allocation5 + $0x218] sm:$0xff]  ;;  %v271_v50 = vld [vmem:[#allocation5 + $0x2a0] sm:$0xff]  ;;  %v180_v53 = vld [vmem:[%s892_s6 + $0x8] sm:$0xff] }
  0x55   : > { %398 = vmatpush.msrb.mxu0 %v263_v10  ;;  %417 = vmatpush.msrb.mxu1 %v280_v11  ;;  %v286_v51 = vld [vmem:[#allocation5 + $0x318] sm:$0xff]  ;;  %v303_v52 = vld [vmem:[#allocation5 + $0x3a0] sm:$0xff]  ;;  %v253_v54 = vld [vmem:[#allocation5 + $0x210] sm:$0xff] }
  0x56   : > { %438 = vmatpush.msrb.mxu2 %v295_v12  ;;  %457 = vmatpush.msrb.mxu3 %v312_v13  ;;  %v270_v55 = vld [vmem:[#allocation5 + $0x298] sm:$0xff]  ;;  %v285_v56 = vld [vmem:[#allocation5 + $0x310] sm:$0xff]  ;;  %v252_v58 = vld [vmem:[#allocation5 + $0x208] sm:$0xff] }
  0x57   : > { %399 = vmatpush.msrb.mxu0 %v262_v14  ;;  %418 = vmatpush.msrb.mxu1 %v279_v15  ;;  %v302_v57 = vld [vmem:[#allocation5 + $0x398] sm:$0xff]  ;;  %v269_v59 = vld [vmem:[#allocation5 + $0x290] sm:$0xff]  ;;  %v284_v60 = vld [vmem:[#allocation5 + $0x308] sm:$0xff] }
  0x58   : > { %439 = vmatpush.msrb.mxu2 %v294_v16  ;;  %458 = vmatpush.msrb.mxu3 %v311_v17  ;;  %v301_v61 = vld [vmem:[#allocation5 + $0x390] sm:$0xff]  ;;  %v251_v62 = vld [vmem:[#allocation5 + $0x200] sm:$0xff]  ;;  %v268_v63 = vld [vmem:[#allocation5 + $0x288] sm:$0xff] }
  0x59   : > { %400 = vmatpush.msrb.mxu0 %v261_v18  ;;  %419 = vmatpush.msrb.mxu1 %v278_v19  ;;  %v283_v0 = vld [vmem:[#allocation5 + $0x300] sm:$0xff]  ;;  %v300_v1 = vld [vmem:[#allocation5 + $0x388] sm:$0xff]  ;;  %v185_v3 = vld [vmem:[%s892_s6 + $0x30] sm:$0xff] }
  0x5a   : > { %440 = vmatpush.msrb.mxu2 %v293_v20  ;;  %459 = vmatpush.msrb.mxu3 %v310_v21  ;;  %v183_v2 = vld [vmem:[%s892_s6 + $0x20] sm:$0xff]  ;;  %v184_v6 = vld [vmem:[%s892_s6 + $0x28] sm:$0xff]  ;;  %v186_v7 = vld [vmem:[%s892_s6 + $0x38] sm:$0xff] }
  0x5b   : > { %401 = vmatpush.msrb.mxu0 %v260_v22  ;;  %420 = vmatpush.msrb.mxu1 %v277_v23  ;;  %v267_v4 = vld [vmem:[#allocation5 + $0x280] sm:$0xff] }
  0x5c   : > { %441 = vmatpush.msrb.mxu2 %v292_v24  ;;  %460 = vmatpush.msrb.mxu3 %v309_v25  ;;  %v299_v5 = vld [vmem:[#allocation5 + $0x380] sm:$0xff] }
  0x5d   : > { %402 = vmatpush.msrb.mxu0 %v259_v26  ;;  %421 = vmatpush.msrb.mxu1 %v276_v27 }
  0x5e   : > { %442 = vmatpush.msrb.mxu2 %v291_v28  ;;  %461 = vmatpush.msrb.mxu3 %v308_v29 }
  0x5f   : > { %403 = vmatpush.msrb.mxu0 %v258_v30  ;;  %422 = vmatpush.msrb.mxu1 %v275_v31 }
  0x60   : > { %443 = vmatpush.msrb.mxu2 %v290_v32  ;;  %462 = vmatpush.msrb.mxu3 %v307_v33 }
  0x61   : > { %404 = vmatpush.msrb.mxu0 %v257_v34  ;;  %423 = vmatpush.msrb.mxu1 %v274_v35 }
  0x62   : > { %444 = vmatpush.msrb.mxu2 %v289_v36  ;;  %463 = vmatpush.msrb.mxu3 %v306_v37 }
  0x63   : > { %405 = vmatpush.msrb.mxu0 %v256_v38  ;;  %424 = vmatpush.msrb.mxu1 %v273_v39 }
  0x64   : > { %445 = vmatpush.msrb.mxu2 %v288_v40  ;;  %464 = vmatpush.msrb.mxu3 %v305_v41 }
  0x65   : > { %371 = vmatmul.f32.vlgmr.msra.gmra.mxu2 %v181_v42  ;;  %406 = vmatpush.msrb.mxu0 %v255_v43 }
  0x66   : > { %425 = vmatpush.msrb.mxu1 %v272_v44  ;;  %446 = vmatpush.msrb.mxu2 %v287_v45 }
  0x67   : > { %465 = vmatpush.msrb.mxu3 %v304_v46  ;;  %331 = vmatmul.f32.vlgmr.msra.gmra.mxu0 %v179_v47 }
  0x68   : > { %391 = vmatmul.f32.vlgmr.msra.gmra.mxu3 %v182_v48  ;;  %407 = vmatpush.msrb.mxu0 %v254_v49 }
  0x69   : > { %426 = vmatpush.msrb.mxu1 %v271_v50  ;;  %447 = vmatpush.msrb.mxu2 %v286_v51 }
  0x6a   : > { %466 = vmatpush.msrb.mxu3 %v303_v52  ;;  %351 = vmatmul.f32.vlgmr.msra.gmra.mxu1 %v180_v53 }
  0x6b   : > { %408 = vmatpush.msrb.mxu0 %v253_v54  ;;  %427 = vmatpush.msrb.mxu1 %v270_v55 }
  0x6c   : > { %448 = vmatpush.msrb.mxu2 %v285_v56  ;;  %467 = vmatpush.msrb.mxu3 %v302_v57 }
  0x6d   : > { %409 = vmatpush.msrb.mxu0 %v252_v58  ;;  %428 = vmatpush.msrb.mxu1 %v269_v59 }
  0x6e   : > { %449 = vmatpush.msrb.mxu2 %v284_v60  ;;  %468 = vmatpush.msrb.mxu3 %v301_v61 }
  0x6f   : > { %410 = vmatpush.msrb.mxu0 %v251_v62  ;;  %429 = vmatpush.msrb.mxu1 %v268_v63 }
  0x70   : > { %450 = vmatpush.msrb.mxu2 %v283_v0  ;;  %469 = vmatpush.msrb.mxu3 %v300_v1 }
  0x71   : > { %411 = vmatmul.f32.vlgmr.msrb.gmra.mxu0 %v183_v2  ;;  %451 = vmatmul.f32.vlgmr.msrb.gmra.mxu2 %v185_v3 }
  0x72   : > { %430 = vmatpush.msrb.mxu1 %v267_v4  ;;  %470 = vmatpush.msrb.mxu3 %v299_v5 }
  0x73   : > { %431 = vmatmul.f32.vlgmr.msrb.gmra.mxu1 %v184_v6  ;;  %471 = vmatmul.f32.vlgmr.msrb.gmra.mxu3 %v186_v7 }
  0xe4   : > { %v332_v8 = vpop.f32.mrf.mxu0 }
  0xe7   : > { %v352_v9 = vpop.f32.mrf.mxu1 }
  0xe8   : > { %v353_v10 = vadd.f32 %v352_v9, %v332_v8  ;;  %v372_v11 = vpop.f32.mrf.mxu2 }
  0xea   : > { %v373_v12 = vadd.f32 %v372_v11, %v353_v10 }
  0xeb   : > { %v392_v13 = vpop.f32.mrf.mxu3 }
  0xec   : > { %v393_v14 = vadd.f32 %v392_v13, %v373_v12 }
  0xee   : > { %v412_v15 = vpop.f32.mrf.mxu0 }
  0xef   : > { %v413_v16 = vadd.f32 %v412_v15, %v393_v14 }
  0xf0   : > { %v432_v17 = vpop.f32.mrf.mxu1 }
  0xf1   : > { %v433_v18 = vadd.f32 %v432_v17, %v413_v16 }
  0xf4   : > { %v452_v19 = vpop.f32.mrf.mxu2 }
  0xf5   : > { %v453_v20 = vadd.f32 %v452_v19, %v433_v18 }
  0xf6   : > { %v472_v21 = vpop.f32.mrf.mxu3 }
  0xf7   : > { %v473_v22 = vadd.f32 %v472_v21, %v453_v20 }
  0xf9   : > { %475 = vst [vmem:[%s178_s14] sm:$0xff] %v473_v22 }
  0xfa   : > { %734 = shalt.err (!%p731_p9)
}
  0xfb   : > { %594 = dma.vmem_to_hbm [thread:$0]  (%p857_p13), %s490_s15, 128, %s492_s18, %s477_s19  }
  0xfc PF: > { %s503_s29 = sand.u32 1, %s765_s9   ;;  %p952_p10 = scmp.ge.s32.totalorder %s777_s12, 2 }
  0xfd   : > { %s504_s4 = scalar_lea.sflag [#allocation4], %s503_s29 }
  0xfe   : > { %p605_p11 = pnand %p952_p10, %p862_p4 }
 0x100   : > { %p606_p0 = pneg %p605_p11 }
 0x102   : > { %760 = dma.done.wait (%p606_p0), %s504_s4, 128  }
 0x103   : > { %762 = vsyncadd (%p606_p0), %s504_s4, 4294967168  ;;  %p16_p2 = scmp.ge.s32.totalorder %s837_s23, 4   ;;  %s953_s9 = smov %s769_s10 }
 0x104   : > { %s954_s10 = smov %s773_s11  ;;  %s955_s11 = smov %s849_s26 }
 0x105   : > { %s956_s12 = smov %s837_s23  ;;  %18 = sbr.rel (!%p16_p2) target bundleno = 6 (0x6), region = 77 }
 0x10a   :  { %510 = vsyncpa [#allocation3], 1 }
 0x10b   :  { %512 = vsyncpa [#allocation3 + $0x1], 1 }
 0x10c   :  { %513 = vsyncpa [#allocation6], 1 }
 0x10d   :  { %514 = vsyncpa [#allocation4], 1 }
 0x10e   :  { %516 = vsyncpa [#allocation4 + $0x1], 1 }

</bundles_post_ra>
